<compile_context>
chip_gen: v7x
topology: tpu7x:2x2x1
jax: 0.10.0
libtpu: 0.0.40
codegen_flags: <defaults>
</compile_context>

<pallas_src>
from typing import NamedTuple

import jax
import jax.numpy as jnp
from jax.experimental import pallas as pl
from jax.experimental.pallas import tpu as pltpu


# ---------------------------------------------------------------------------
# helpers
# ---------------------------------------------------------------------------
def _round_up(v, m):
    return ((v + m - 1) // m) * m


def _cdiv(a, b):
    return -(-a // b)


class _Plan(NamedTuple):
    resident: bool
    Kp: int
    Np: int
    tk: int
    tn: int


def make_plan(in_features, num_class):
    """Static (trace-time) tiling plan, derived only from K and N."""
    Kp = _round_up(in_features, 128)
    Np = _round_up(num_class, 128)
    # Budget: 2x (double-buffer-counted) resident weight + 2x x/out tiles
    # (worst-case tm=256) + bias.  Must fit comfortably in v7x's 64 MiB VMEM.
    resident_bytes = 2 * Kp * Np * 2 + 2 * 256 * (Kp + Np) * 4 + Np * 4
    if resident_bytes <= 40 * 1024 * 1024:
        return _Plan(True, Kp, Np, Kp, Np)
    tk = min(Kp, 512)
    tn = min(Np, 512)
    return _Plan(False, _round_up(in_features, tk), _round_up(num_class, tn), tk, tn)


# ---------------------------------------------------------------------------
# kernels
# ---------------------------------------------------------------------------
def _linear_kernel_resident(x_ref, w_ref, b_ref, o_ref):
    # x: (tm, Kp) f32 (cast to bf16 on the fly), w: (Kp, Np) bf16 resident,
    # b: (1, Np) f32, o: (tm, Np) f32.
    o_ref[...] = (
        jnp.dot(x_ref[...].astype(jnp.bfloat16), w_ref[...],
                preferred_element_type=jnp.float32)
        + b_ref[...]
    ).astype(o_ref.dtype)


def _linear_kernel_tiled(x_ref, w_ref, b_ref, o_ref):
    # Output tile is resident across the k axis (same block index) -> use it
    # directly as the f32 accumulator; bias folded into the k==0 init.
    @pl.when(pl.program_id(2) == 0)
    def _():
        o_ref[...] = jnp.broadcast_to(b_ref[...], o_ref.shape)

    o_ref[...] += jnp.dot(x_ref[...].astype(jnp.bfloat16), w_ref[...],
                          preferred_element_type=jnp.float32)


# ---------------------------------------------------------------------------
# wrapper
# ---------------------------------------------------------------------------
def pallas_linear(x, w_pad, b_pad, *, plan: _Plan, n_out: int):
    """y = x @ W.T + b  (W stored pre-transposed/padded as w_pad (Kp, Np) bf16,
    bias pre-padded as b_pad (1, Np) f32).  Returns (M, n_out) float32."""
    M, K = x.shape
    Kp, Np = plan.Kp, plan.Np
    assert K <= Kp

    # Balanced M tile: avoid padding M way past its value, keep multiples of 8
    # (f32 sublane).  If a single M tile would leave the 2nd v7x TensorCore
    # idle and there is enough work, split it in two.
    cap = 256
    tm = _round_up(_cdiv(M, _cdiv(M, cap)), 8)
    if M >= 32 and _cdiv(M, tm) == 1:
        tm = _round_up(_cdiv(tm, 2), 8)
    Mp = _round_up(M, tm)

    xp = x
    if (Mp, Kp) != (M, K):
        xp = jnp.pad(x, ((0, Mp - M), (0, Kp - K)))

    if plan.resident:
        footprint = (2 * tm * Kp * 4       # double-buffered x tiles (f32)
                     + 2 * Kp * Np * 2     # weight (bf16)
                     + 2 * Np * 4          # bias
                     + 2 * tm * Np * 4)    # output tiles (f32)
        vmem_limit = min(max(footprint + (4 << 20), 32 << 20), 48 << 20)
        out = pl.pallas_call(
            _linear_kernel_resident,
            out_shape=jax.ShapeDtypeStruct((Mp, Np), jnp.float32),
            grid_spec=pltpu.PrefetchScalarGridSpec(
                num_scalar_prefetch=0,
                grid=(Mp // tm,),
                in_specs=[
                    pl.BlockSpec((tm, Kp), lambda i: (i, 0)),
                    pl.BlockSpec((Kp, Np), lambda i: (0, 0)),  # weight fetched once
                    pl.BlockSpec((1, Np), lambda i: (0, 0)),
                ],
                out_specs=pl.BlockSpec((tm, Np), lambda i: (i, 0)),
            ),
            compiler_params=pltpu.CompilerParams(
                dimension_semantics=("parallel",),
                vmem_limit_bytes=vmem_limit,
            ),
        )(xp, w_pad, b_pad)
    else:
        tk, tn = plan.tk, plan.tn
        out = pl.pallas_call(
            _linear_kernel_tiled,
            out_shape=jax.ShapeDtypeStruct((Mp, Np), jnp.float32),
            grid_spec=pltpu.PrefetchScalarGridSpec(
                num_scalar_prefetch=0,
                grid=(Mp // tm, Np // tn, Kp // tk),
                in_specs=[
                    pl.BlockSpec((tm, tk), lambda i, j, k: (i, k)),
                    pl.BlockSpec((tk, tn), lambda i, j, k: (k, j)),
                    pl.BlockSpec((1, tn), lambda i, j, k: (0, j)),
                ],
                out_specs=pl.BlockSpec((tm, tn), lambda i, j, k: (i, j)),
            ),
            compiler_params=pltpu.CompilerParams(
                dimension_semantics=("parallel", "parallel", "arbitrary"),
                vmem_limit_bytes=32 * 1024 * 1024,
            ),
        )(xp, w_pad, b_pad)

    if (Mp, Np) != (M, n_out):
        out = out[:M, :n_out]
    return out


# ---------------------------------------------------------------------------
# SingleClassifier
# ---------------------------------------------------------------------------
def init_params(key, in_features, num_class):
    """PyTorch nn.Linear convention: weight (out, in), bias (out,), float32."""
    wk, bk = jax.random.split(key)
    bound = 1.0 / (in_features ** 0.5)
    weight = jax.random.uniform(
        wk, (num_class, in_features), jnp.float32, -bound, bound
    )
    bias = jax.random.uniform(bk, (num_class,), jnp.float32, -bound, bound)
    return {"weight": weight, "bias": bias}


def prepare_params(params, plan: _Plan):
    """One-time prep: transpose to (K, N), cast to bf16, pad to the tile grid.
    The per-forward weight stream is then a single bf16 read."""
    w = jnp.asarray(params["weight"])          # (N, K)
    b = jnp.asarray(params["bias"])            # (N,)
    N, K = w.shape
    w_kn = w.T.astype(jnp.bfloat16)            # (K, N)
    w_pad = jnp.pad(w_kn, ((0, plan.Kp - K), (0, plan.Np - N)))
    b_pad = jnp.pad(b.reshape(1, N).astype(jnp.float32),
                    ((0, 0), (0, plan.Np - N)))
    return {"weight_kn": w_pad, "bias": b_pad}


def make_single_classifier(params):
    """Returns (prepared_param_arrays, jitted forward(prepared, x))."""
    N, K = params["weight"].shape
    plan = make_plan(K, N)
    prepared = prepare_params(params, plan)

    @jax.jit
    def forward(prepared, x):
        # forward(x) = self.classifier(x) -> plain Linear, no activation.
        return pallas_linear(x, prepared["weight_kn"], prepared["bias"],
                             plan=plan, n_out=N)

    return prepared, forward


if __name__ == "__main__":
    key = jax.random.PRNGKey(0)
    pkey, xkey, pkey2, xkey2 = jax.random.split(key, 4)

    # --- small demo shape (batch=2, in_features=32, num_class=8) ------------
    batch, in_features, num_class = 2, 32, 8
    params = init_params(pkey, in_features, num_class)
    prepared, forward = make_single_classifier(params)

    x = jax.random.normal(xkey, (batch, in_features), jnp.float32)
    out = jax.block_until_ready(forward(prepared, x))

    assert out.shape == (batch, num_class), out.shape
    assert bool(jnp.all(jnp.isfinite(out)))
    ref = x @ params["weight"].T + params["bias"]
    assert bool(jnp.allclose(out, ref, rtol=5e-2, atol=1.5e-1)), (
        float(jnp.max(jnp.abs(out - ref)))
    )

    # --- second shape exercising multi-M-tile + non-aligned dims ------------
    batch2, in2, nc2 = 300, 384, 10
    params2 = init_params(pkey2, in2, nc2)
    prepared2, forward2 = make_single_classifier(params2)
    x2 = jax.random.normal(xkey2, (batch2, in2), jnp.float32)
    out2 = jax.block_until_ready(forward2(prepared2, x2))
    assert out2.shape == (batch2, nc2), out2.shape
    ref2 = x2 @ params2["weight"].T + params2["bias"]
    assert bool(jnp.allclose(out2, ref2, rtol=5e-2, atol=1.5e-1)), (
        float(jnp.max(jnp.abs(out2 - ref2)))
    )

    print("KERNEL_OK")
</pallas_src>

<mosaic_0001>
module attributes {stable_mosaic.version = 11 : i64} {
  func.func @_linear_kernel_resident(%arg0: i32, %arg1: memref<8x128xf32, #tpu.memory_space<vmem>>, %arg2: memref<128x128xbf16, #tpu.memory_space<vmem>>, %arg3: memref<1x128xf32, #tpu.memory_space<vmem>>, %arg4: memref<8x128xf32, #tpu.memory_space<vmem>>) attributes {dimension_semantics = [#tpu.dimension_semantics<parallel>], iteration_bounds = array<i64: 1>, scalar_prefetch = 0 : i64, scratch_operands = 0 : i64, tpu.core_type = #tpu.core_type<tc>, window_params = [{transform_indices = @transform_0, window_bounds = array<i64: 8, 128>}, {pipeline_mode = #tpu.pipeline_mode<synchronous>, transform_indices = @transform_1, window_bounds = array<i64: 128, 128>}, {pipeline_mode = #tpu.pipeline_mode<synchronous>, transform_indices = @transform_2, window_bounds = array<i64: 1, 128>}, {transform_indices = @transform_3, window_bounds = array<i64: 8, 128>}]} {
    %c0 = arith.constant 0 : index
    %c0_0 = arith.constant 0 : index
    %0 = vector.load %arg1[%c0, %c0_0] : memref<8x128xf32, #tpu.memory_space<vmem>>, vector<8x128xf32>
    %1 = arith.truncf %0 : vector<8x128xf32> to vector<8x128xbf16>
    %c0_1 = arith.constant 0 : index
    %c0_2 = arith.constant 0 : index
    %2 = vector.load %arg2[%c0_1, %c0_2] : memref<128x128xbf16, #tpu.memory_space<vmem>>, vector<128x128xbf16>
    %cst = arith.constant dense<0.000000e+00> : vector<8x128xf32>
    %3 = tpu.matmul %1, %2, %cst {dimension_numbers = #tpu.dot_dimension_numbers<[1], [0], [0], [1], [0, 0, 1, 1], [], []>} : vector<8x128xbf16>, vector<128x128xbf16>, vector<8x128xf32> -> vector<8x128xf32>
    %c0_3 = arith.constant 0 : index
    %c0_4 = arith.constant 0 : index
    %4 = vector.load %arg3[%c0_3, %c0_4] : memref<1x128xf32, #tpu.memory_space<vmem>>, vector<1x128xf32>
    %5 = vector.broadcast %4 : vector<1x128xf32> to vector<8x128xf32>
    %6 = arith.addf %3, %5 : vector<8x128xf32>
    %c0_5 = arith.constant 0 : index
    %c0_6 = arith.constant 0 : index
    %7 = vector.load %arg4[%c0_5, %c0_6] : memref<8x128xf32, #tpu.memory_space<vmem>>, vector<8x128xf32>
    tpu.vector_store %arg4[%c0_5, %c0_6], %6 {strides = array<i32>} : memref<8x128xf32, #tpu.memory_space<vmem>>, vector<8x128xf32>,
    return
  }
  func.func @transform_0(%arg0: i32) -> (i32, i32) {
    %c0_i32 = arith.constant 0 : i32
    %c0_i32_0 = arith.constant 0 : i32
    return %arg0, %c0_i32 : i32, i32
  }
  func.func @transform_1(%arg0: i32) -> (i32, i32) {
    %c0_i32 = arith.constant 0 : i32
    %c0_i32_0 = arith.constant 0 : i32
    %c0_i32_1 = arith.constant 0 : i32
    return %c0_i32, %c0_i32_0 : i32, i32
  }
  func.func @transform_2(%arg0: i32) -> (i32, i32) {
    %c0_i32 = arith.constant 0 : i32
    %c0_i32_0 = arith.constant 0 : i32
    %c0_i32_1 = arith.constant 0 : i32
    return %c0_i32, %c0_i32_0 : i32, i32
  }
  func.func @transform_3(%arg0: i32) -> (i32, i32) {
    %c0_i32 = arith.constant 0 : i32
    %c0_i32_0 = arith.constant 0 : i32
    return %arg0, %c0_i32 : i32, i32
  }
}

</mosaic_0001>

<bundles_post_ra>
// kernel: forward.1
= control target key start
LH: loop header
LB: loop body
LE: loop exit
PB: predicated region body
PF: predicated region fallthrough
CT: control target
= control target key end

     0   :  { %8 = vsyncpa [#allocation3], 0  ;;  %s223_s12 = smov [#allocation2]   ;;  %s269_s0 = inlined_call_operand.vmem [shape: f32[8,128], index: 0, kind: input, shape index: {}]   ;;  %s270_s1 = inlined_call_operand.hbm [shape: bf16[128,128], index: 1, kind: input, shape index: {}]   ;;  %s271_s2 = inlined_call_operand.vmem [shape: f32[1,128], index: 2, kind: input, shape index: {}]   ;;  %s272_s3 = inlined_call_operand.vmem [shape: f32[8,128], index: 3, kind: output, shape index: {}]  }
   0x1   :  { %s16_s13 = sshll.u32 %s223_s12, 4  ;;  %s199_s16 = scalar_lea.hbm %s270_s1, 1024  ;;  %s17_s13 = int_to_ptr.vmem [resolvable:$true] %s16_s13 }
   0x2   :  { %p200_p0 = scmp.ne.s32.totalorder %s270_s1, %s199_s16  ;;  %p203_p1 = scmp.lt.u32.totalorder %s199_s16, %s270_s1 }
   0x4   :  { %p205_p2 = pnand %p203_p1, %p200_p0 }
   0x6   :  { %208 = shalt.err (!%p205_p2)
}
   0x7   :  { %s209_s21 = scalar_lea.vmem %s17_s13, 1024  ;;  %p214_p4 = scmp.lt.s32.totalorder %s17_s13, %s17_s13 }
   0x8   :  { %p210_p3 = scmp.ne.s32.totalorder %s17_s13, %s209_s21  ;;  %p215_p5 = scmp.lt.s32.totalorder %s209_s21, %s209_s21 }
   0xa   :  { %p216_p6 = por %p215_p5, %p214_p4 }
   0xc   :  { %p217_p7 = pnand %p216_p6, %p210_p3 }
   0xe   :  { %220 = shalt.err (!%p217_p7)
}
   0xf   :  { %s224_s22 = smov 64   ;;  %s225_s23 = smov 4  }
  0x10   :  { %22 = dma.hbm_to_vmem [thread:$0]  %s270_s1, 1024, %s17_s13, [#allocation3], %s224_s22, %s224_s22, %s225_s23  }
  0x11   :  { %221 = dma.done.wait [#allocation3], 1024  }
  0x12   :  { %222 = vsyncadd [#allocation3], 4294966272  ;;  %v226_v0 = vmov 0.0   ;;  %vm227_vm0 = vmmov 0   ;;  %v191_v1 = vld [vmem:[#allocation2] sm:$0xff]   ;;  %v192_v2 = vld [vmem:[#allocation2 + $0x8] sm:$0xff]  }
  0x13   :  { %166 = vmatprep.subr.bf16.mxu0 %v226_v0  ;;  %182 = vmatprep.mubr.msk.bf16.mxu0 %vm227_vm0, %v226_v0  ;;  %v193_v3 = vld [vmem:[#allocation2 + $0x10] sm:$0xff]   ;;  %v194_v4 = vld [vmem:[#allocation2 + $0x18] sm:$0xff]   ;;  %v195_v5 = vld [vmem:[#allocation2 + $0x20] sm:$0xff]  }
  0x14   :  { %167 = vmatpush3.bf16.msra.mxu0 %v191_v1  ;;  %v196_v6 = vld [vmem:[#allocation2 + $0x28] sm:$0xff]   ;;  %v197_v7 = vld [vmem:[#allocation2 + $0x30] sm:$0xff]   ;;  %v198_v8 = vld [vmem:[#allocation2 + $0x38] sm:$0xff]  }
  0x15   :  { %168 = vmatprep.subr.bf16.mxu0 %v226_v0  ;;  %v29_v9 = vld [vmem:[%s269_s0] sm:$0xff] }
  0x16   :  { %v30_v10 = vpack.c.bf16 %v29_v9, %v29_v9  ;;  %v148_v11 = vld [vmem:[%s271_s2] ss:$0 sm:$0xff] }
  0x18   :  { %169 = vmatpush3.bf16.msra.mxu0 %v192_v2 }
  0x19   :  { %170 = vmatprep.subr.bf16.mxu0 %v226_v0 }
  0x1c   :  { %171 = vmatpush3.bf16.msra.mxu0 %v193_v3 }
  0x1d   :  { %172 = vmatprep.subr.bf16.mxu0 %v226_v0 }
  0x20   :  { %173 = vmatpush3.bf16.msra.mxu0 %v194_v4 }
  0x21   :  { %174 = vmatprep.subr.bf16.mxu0 %v226_v0 }
  0x24   :  { %175 = vmatpush3.bf16.msra.mxu0 %v195_v5 }
  0x25   :  { %176 = vmatprep.subr.bf16.mxu0 %v226_v0 }
  0x28   :  { %177 = vmatpush3.bf16.msra.mxu0 %v196_v6 }
  0x29   :  { %178 = vmatprep.subr.bf16.mxu0 %v226_v0 }
  0x2c   :  { %179 = vmatpush3.bf16.msra.mxu0 %v197_v7 }
  0x2d   :  { %180 = vmatprep.subr.bf16.mxu0 %v226_v0 }
  0x30   :  { %181 = vmatpush3.bf16.msra.mxu0 %v198_v8 }
  0x33   :  { %183 = vmatmul.mubr.bf16.vlgmr.msra.gmra.mrb[0].mxu0 %v30_v10 }
 0x106   :  { %v136_v12 = vpop.f32.mrb[0].mxu0 }
 0x107   :  { %v137_v13 = vadd.f32 %v148_v11, %v136_v12  ;;  %v184_v14 = vpop.f32.mrb[1].mxu0 }
 0x108   :  { %v139_v15 = vpop.f32.mrb[2].mxu0 }
 0x109   :  { %142 = vst [vmem:[%s272_s3] sm:$0xff] %v137_v13  ;;  %v185_v16 = vpop.f32.mrb[3].mxu0 }
 0x10a   :  { %147 = vsyncpa [#allocation3], 1 }

</bundles_post_ra>
